<compile_context>
chip_gen: v7x
topology: tpu7x:2x2x1
jax: 0.10.0
libtpu: 0.0.40
codegen_flags: <defaults>
</compile_context>

<pallas_src>
import functools

import jax
import jax.numpy as jnp
from jax.experimental import pallas as pl
from jax.experimental.pallas import tpu as pltpu

HP = 128  # padded hidden width (lane-dense)


# ----------------------------------------------------------------------------
# Pallas kernel: all GRU-GCN layers in one call, grid = (n_layer,)
# ----------------------------------------------------------------------------
def _gru_gcn_fused_kernel(adj_ref, x0_ref, h_ref, wx_ref, wh2_ref, whh_ref,
                          b_ref, hout_ref, xc_ref):
    layer = pl.program_id(0)

    # Layer 0 consumes the (padded) node features; later layers consume the
    # previous layer's output carried in the VMEM scratch.
    @pl.when(layer == 0)
    def _():
        xc_ref[...] = x0_ref[...]

    adj = adj_ref[...]            # (N, N)
    x = xc_ref[...]               # (N, Hp)
    h = h_ref[...]                # (N, Hp)
    hp = h.shape[1]

    # --- adjacency aggregation done once per operand (re-associated GCN) ---
    agg_x = jnp.dot(adj, x, preferred_element_type=jnp.float32)   # (N, Hp)
    agg_h = jnp.dot(adj, h, preferred_element_type=jnp.float32)   # (N, Hp)

    # --- fused gate projections (lane-dense outputs: 3*Hp and 2*Hp) --------
    gx = jnp.dot(agg_x, wx_ref[...], preferred_element_type=jnp.float32)   # (N, 3Hp)
    gh = jnp.dot(agg_h, wh2_ref[...], preferred_element_type=jnp.float32)  # (N, 2Hp)

    bz = b_ref[0:1, :]            # (1, Hp) — already bxz + bhz
    br = b_ref[1:2, :]
    bh = b_ref[2:3, :]            # bxh + bhh

    z = jax.nn.sigmoid(gx[:, 0:hp] + gh[:, 0:hp] + bz)
    r = jax.nn.sigmoid(gx[:, hp:2 * hp] + gh[:, hp:2 * hp] + br)

    # candidate state: Â@(r*h) is the only remaining per-gate aggregation
    agg_rh = jnp.dot(adj, r * h, preferred_element_type=jnp.float32)
    h_tilde = jnp.tanh(
        gx[:, 2 * hp:3 * hp]
        + jnp.dot(agg_rh, whh_ref[...], preferred_element_type=jnp.float32)
        + bh)

    h_new = z * h + (1.0 - z) * h_tilde
    hout_ref[...] = h_new
    xc_ref[...] = h_new           # carry to next layer


# ----------------------------------------------------------------------------
# Wrapper: parameter packing + pallas_call
# ----------------------------------------------------------------------------
def _pad2(w, rows, cols):
    out = jnp.zeros((rows, cols), jnp.float32)
    return out.at[:w.shape[0], :w.shape[1]].set(w.astype(jnp.float32))


def pack_params(layer_params, hp=HP):
    """Fuse/pad per-layer GCN weights & biases, stacked along a layer axis."""
    wx_l, wh2_l, whh_l, b_l = [], [], [], []
    for p in layer_params:
        # x-side gates: [Wxz | Wxr | Wxh], each padded to an Hp-wide slab
        wx = jnp.concatenate([_pad2(p["wxz"], hp, hp),
                              _pad2(p["wxr"], hp, hp),
                              _pad2(p["wxh"], hp, hp)], axis=1)      # (Hp, 3Hp)
        # h-side gates: [Whz | Whr]
        wh2 = jnp.concatenate([_pad2(p["whz"], hp, hp),
                               _pad2(p["whr"], hp, hp)], axis=1)     # (Hp, 2Hp)
        whh = _pad2(p["whh"], hp, hp)                                # (Hp, Hp)
        b = jnp.concatenate([_pad2(p["bxz"] + p["bhz"], 1, hp),
                             _pad2(p["bxr"] + p["bhr"], 1, hp),
                             _pad2(p["bxh"] + p["bhh"], 1, hp)], axis=0)  # (3, Hp)
        wx_l.append(wx); wh2_l.append(wh2); whh_l.append(whh); b_l.append(b)
    return (jnp.stack(wx_l), jnp.stack(wh2_l), jnp.stack(whh_l), jnp.stack(b_l))


@functools.partial(jax.jit, static_argnames=("n_layer", "hidden_size", "hp"))
def graph_gru_gcn_forward(inp, adj, h, packed, n_layer, hidden_size, hp=HP):
    """
    inp:    (N, input_size)           node features
    adj:    (N, N)                    normalized dense adjacency
    h:      (n_layer, N, hidden_size) previous hidden states
    packed: output of pack_params
    Returns (out, h_out) exactly like the PyTorch module (out is h_out).
    """
    n = inp.shape[0]
    wx, wh2, whh, b = packed

    # zero-pad features / hidden to the lane-dense width hp
    x0 = jnp.zeros((n, hp), jnp.float32).at[:, :inp.shape[1]].set(inp)
    h_pad = jnp.zeros((n_layer, n, hp), jnp.float32).at[:, :, :hidden_size].set(h)

    flops = n_layer * (6 * n * n * hp + 12 * n * hp * hp)
    transcendentals = n_layer * 3 * n * hp
    bytes_accessed = 4 * (adj.size + x0.size + h_pad.size + wx.size
                          + wh2.size + whh.size + b.size + n_layer * n * hp)

    h_out_pad = pl.pallas_call(
        _gru_gcn_fused_kernel,
        out_shape=jax.ShapeDtypeStruct((n_layer, n, hp), jnp.float32),
        grid_spec=pltpu.PrefetchScalarGridSpec(
            num_scalar_prefetch=0,
            grid=(n_layer,),
            in_specs=[
                pl.BlockSpec((n, n), lambda l: (0, 0)),              # adj (resident)
                pl.BlockSpec((n, hp), lambda l: (0, 0)),             # x0
                pl.BlockSpec((None, n, hp), lambda l: (l, 0, 0)),    # h[l]
                pl.BlockSpec((None, hp, 3 * hp), lambda l: (l, 0, 0)),  # Wx fused
                pl.BlockSpec((None, hp, 2 * hp), lambda l: (l, 0, 0)),  # Whz|Whr
                pl.BlockSpec((None, hp, hp), lambda l: (l, 0, 0)),   # Whh
                pl.BlockSpec((None, 3, hp), lambda l: (l, 0, 0)),    # biases
            ],
            out_specs=pl.BlockSpec((None, n, hp), lambda l: (l, 0, 0)),
            scratch_shapes=[pltpu.VMEM((n, hp), jnp.float32)],       # layer carry
        ),
        compiler_params=pltpu.CompilerParams(
            dimension_semantics=("arbitrary",)),
        cost_estimate=pl.CostEstimate(
            flops=flops, transcendentals=transcendentals,
            bytes_accessed=bytes_accessed),
    )(adj, x0, h_pad, wx, wh2, whh, b)

    h_out = h_out_pad[:, :, :hidden_size]
    return h_out, h_out


# ----------------------------------------------------------------------------
# Plain-JAX glue (adjacency build, init) and a reference for verification
# ----------------------------------------------------------------------------
def normalized_adjacency(edge_index, num_nodes):
    """Dense Â = D^{-1/2}(A + I)D^{-1/2}; duplicate edges collapse to 1 and
    pre-existing self loops are not double-counted (add_remaining_self_loops
    semantics)."""
    a = jnp.zeros((num_nodes, num_nodes), jnp.float32)
    a = a.at[edge_index[0], edge_index[1]].set(1.0)
    a = jnp.maximum(a, jnp.eye(num_nodes, dtype=jnp.float32))
    deg = jnp.sum(a, axis=1)
    d_inv_sqrt = 1.0 / jnp.sqrt(jnp.maximum(deg, 1e-12))
    return a * d_inv_sqrt[:, None] * d_inv_sqrt[None, :]


def init_params(key, input_size, hidden_size, n_layer):
    """Deterministic glorot-style init for all 6*n_layer GCNConv layers."""
    names = ["xz", "hz", "xr", "hr", "xh", "hh"]
    layers = []
    for i in range(n_layer):
        layer = {}
        for name in names:
            din = input_size if (i == 0 and name[0] == "x") else hidden_size
            key, kw = jax.random.split(key)
            scale = jnp.sqrt(6.0 / (din + hidden_size))
            layer[f"w{name}"] = jax.random.uniform(
                kw, (din, hidden_size), jnp.float32, -scale, scale)
            layer[f"b{name}"] = jnp.zeros((1, hidden_size), jnp.float32)
        layers.append(layer)
    return layers


def reference_forward(inp, adj, h, layer_params, n_layer):
    """Pure-JAX reference matching the PyTorch module layer loop."""
    def gcn(feat, w, b):
        return adj @ (feat @ w) + b
    x = inp
    outs = []
    for i in range(n_layer):
        p = layer_params[i]
        hi = h[i]
        z = jax.nn.sigmoid(gcn(x, p["wxz"], p["bxz"]) + gcn(hi, p["whz"], p["bhz"]))
        r = jax.nn.sigmoid(gcn(x, p["wxr"], p["bxr"]) + gcn(hi, p["whr"], p["bhr"]))
        ht = jnp.tanh(gcn(x, p["wxh"], p["bxh"]) + gcn(r * hi, p["whh"], p["bhh"]))
        hn = z * hi + (1.0 - z) * ht
        outs.append(hn)
        x = hn
    ho = jnp.stack(outs, axis=0)
    return ho, ho


# ----------------------------------------------------------------------------
# Demo
# ----------------------------------------------------------------------------
if __name__ == "__main__":
    key = jax.random.PRNGKey(0)

    num_nodes = 16
    input_size = 8
    hidden_size = 32
    n_layer = 2
    num_edges = 40

    k_feat, k_h, k_e0, k_e1, k_params = jax.random.split(key, 5)

    inp = jax.random.normal(k_feat, (num_nodes, input_size), jnp.float32)
    h0 = jax.random.normal(k_h, (n_layer, num_nodes, hidden_size), jnp.float32)
    edge_index = jnp.stack([
        jax.random.randint(k_e0, (num_edges,), 0, num_nodes),
        jax.random.randint(k_e1, (num_edges,), 0, num_nodes),
    ], axis=0)

    adj = normalized_adjacency(edge_index, num_nodes)
    params = init_params(k_params, input_size, hidden_size, n_layer)
    packed = pack_params(params)

    out, h_out = graph_gru_gcn_forward(inp, adj, h0, packed,
                                       n_layer, hidden_size)
    jax.block_until_ready((out, h_out))

    assert out.shape == (n_layer, num_nodes, hidden_size)
    assert h_out.shape == (n_layer, num_nodes, hidden_size)
    assert bool(jnp.all(jnp.isfinite(out)))

    # check against the un-fused pure-JAX reference (re-association changes
    # rounding slightly; TPU default matmul precision is ~bf16-per-pass)
    ref_out, _ = reference_forward(inp, adj, h0, params, n_layer)
    assert bool(jnp.allclose(out, ref_out, atol=3e-2, rtol=3e-2)), (
        float(jnp.max(jnp.abs(out - ref_out))))

    print("KERNEL_OK")
</pallas_src>

<mosaic_0001>
module attributes {stable_mosaic.version = 11 : i64} {
  func.func @_gru_gcn_fused_kernel(%arg0: i32, %arg1: memref<16x16xf32, #tpu.memory_space<vmem>>, %arg2: memref<16x128xf32, #tpu.memory_space<vmem>>, %arg3: memref<1x16x128xf32, #tpu.memory_space<vmem>>, %arg4: memref<1x128x384xf32, #tpu.memory_space<vmem>>, %arg5: memref<1x128x256xf32, #tpu.memory_space<vmem>>, %arg6: memref<1x128x128xf32, #tpu.memory_space<vmem>>, %arg7: memref<1x3x128xf32, #tpu.memory_space<vmem>>, %arg8: memref<1x16x128xf32, #tpu.memory_space<vmem>>, %arg9: memref<16x128xf32, #tpu.memory_space<vmem>>) attributes {dimension_semantics = [#tpu.dimension_semantics<arbitrary>], iteration_bounds = array<i64: 2>, scalar_prefetch = 0 : i64, scratch_operands = 1 : i64, tpu.core_type = #tpu.core_type<tc>, window_params = [{pipeline_mode = #tpu.pipeline_mode<synchronous>, transform_indices = @transform_0, window_bounds = array<i64: 16, 16>}, {pipeline_mode = #tpu.pipeline_mode<synchronous>, transform_indices = @transform_1, window_bounds = array<i64: 16, 128>}, {transform_indices = @transform_2, window_bounds = array<i64: 1, 16, 128>}, {transform_indices = @transform_3, window_bounds = array<i64: 1, 128, 384>}, {transform_indices = @transform_4, window_bounds = array<i64: 1, 128, 256>}, {transform_indices = @transform_5, window_bounds = array<i64: 1, 128, 128>}, {transform_indices = @transform_6, window_bounds = array<i64: 1, 3, 128>}, {transform_indices = @transform_7, window_bounds = array<i64: 1, 16, 128>}]} {
    %c0_i32 = arith.constant 0 : i32
    %0 = arith.cmpi eq, %arg0, %c0_i32 : i32
    %1 = arith.extui %0 : i1 to i32
    %c0_i32_0 = arith.constant 0 : i32
    %2 = arith.cmpi ne, %1, %c0_i32_0 : i32
    scf.if %2 {
      %c0_36 = arith.constant 0 : index
      %c0_37 = arith.constant 0 : index
      %60 = vector.load %arg2[%c0_36, %c0_37] : memref<16x128xf32, #tpu.memory_space<vmem>>, vector<16x128xf32>
      %c0_38 = arith.constant 0 : index
      %c0_39 = arith.constant 0 : index
      %61 = vector.load %arg9[%c0_38, %c0_39] : memref<16x128xf32, #tpu.memory_space<vmem>>, vector<16x128xf32>
      tpu.vector_store %arg9[%c0_38, %c0_39], %60 {strides = array<i32>} : memref<16x128xf32, #tpu.memory_space<vmem>>, vector<16x128xf32>,
    } else {
    }
    %c0 = arith.constant 0 : index
    %c0_1 = arith.constant 0 : index
    %3 = vector.load %arg1[%c0, %c0_1] : memref<16x16xf32, #tpu.memory_space<vmem>>, vector<16x16xf32>
    %c0_2 = arith.constant 0 : index
    %c0_3 = arith.constant 0 : index
    %4 = vector.load %arg9[%c0_2, %c0_3] : memref<16x128xf32, #tpu.memory_space<vmem>>, vector<16x128xf32>
    %c0_4 = arith.constant 0 : index
    %c0_5 = arith.constant 0 : index
    %c0_6 = arith.constant 0 : index
    %5 = vector.load %arg3[%c0_4, %c0_5, %c0_6] : memref<1x16x128xf32, #tpu.memory_space<vmem>>, vector<1x16x128xf32>
    %6 = vector.shape_cast %5 : vector<1x16x128xf32> to vector<16x128xf32>
    %cst = arith.constant dense<0.000000e+00> : vector<16x128xf32>
    %7 = tpu.matmul %3, %4, %cst {dimension_numbers = #tpu.dot_dimension_numbers<[1], [0], [0], [1], [0, 0, 1, 1], [], []>} : vector<16x16xf32>, vector<16x128xf32>, vector<16x128xf32> -> vector<16x128xf32>
    %cst_7 = arith.constant dense<0.000000e+00> : vector<16x128xf32>
    %8 = tpu.matmul %3, %6, %cst_7 {dimension_numbers = #tpu.dot_dimension_numbers<[1], [0], [0], [1], [0, 0, 1, 1], [], []>} : vector<16x16xf32>, vector<16x128xf32>, vector<16x128xf32> -> vector<16x128xf32>
    %c0_8 = arith.constant 0 : index
    %c0_9 = arith.constant 0 : index
    %c0_10 = arith.constant 0 : index
    %9 = vector.load %arg4[%c0_8, %c0_9, %c0_10] : memref<1x128x384xf32, #tpu.memory_space<vmem>>, vector<1x128x384xf32>
    %10 = vector.shape_cast %9 : vector<1x128x384xf32> to vector<128x384xf32>
    %cst_11 = arith.constant dense<0.000000e+00> : vector<16x384xf32>
    %11 = tpu.matmul %7, %10, %cst_11 {dimension_numbers = #tpu.dot_dimension_numbers<[1], [0], [0], [1], [0, 0, 1, 1], [], []>} : vector<16x128xf32>, vector<128x384xf32>, vector<16x384xf32> -> vector<16x384xf32>
    %c0_12 = arith.constant 0 : index
    %c0_13 = arith.constant 0 : index
    %c0_14 = arith.constant 0 : index
    %12 = vector.load %arg5[%c0_12, %c0_13, %c0_14] : memref<1x128x256xf32, #tpu.memory_space<vmem>>, vector<1x128x256xf32>
    %13 = vector.shape_cast %12 : vector<1x128x256xf32> to vector<128x256xf32>
    %cst_15 = arith.constant dense<0.000000e+00> : vector<16x256xf32>
    %14 = tpu.matmul %8, %13, %cst_15 {dimension_numbers = #tpu.dot_dimension_numbers<[1], [0], [0], [1], [0, 0, 1, 1], [], []>} : vector<16x128xf32>, vector<128x256xf32>, vector<16x256xf32> -> vector<16x256xf32>
    %c0_16 = arith.constant 0 : index
    %c0_17 = arith.constant 0 : index
    %c0_18 = arith.constant 0 : index
    %15 = vector.load %arg7[%c0_16, %c0_17, %c0_18] : memref<1x3x128xf32, #tpu.memory_space<vmem>>, vector<1x1x128xf32>
    %16 = vector.shape_cast %15 : vector<1x1x128xf32> to vector<1x128xf32>
    %c0_19 = arith.constant 0 : index
    %c1 = arith.constant 1 : index
    %c0_20 = arith.constant 0 : index
    %17 = vector.load %arg7[%c0_19, %c1, %c0_20] : memref<1x3x128xf32, #tpu.memory_space<vmem>>, vector<1x1x128xf32>
    %18 = vector.shape_cast %17 : vector<1x1x128xf32> to vector<1x128xf32>
    %c0_21 = arith.constant 0 : index
    %c2 = arith.constant 2 : index
    %c0_22 = arith.constant 0 : index
    %19 = vector.load %arg7[%c0_21, %c2, %c0_22] : memref<1x3x128xf32, #tpu.memory_space<vmem>>, vector<1x1x128xf32>
    %20 = vector.shape_cast %19 : vector<1x1x128xf32> to vector<1x128xf32>
    %21 = vector.extract_strided_slice %11 {offsets = [0, 0], sizes = [16, 128], strides = [1, 1]} : vector<16x384xf32> to vector<16x128xf32>
    %22 = vector.extract_strided_slice %14 {offsets = [0, 0], sizes = [16, 128], strides = [1, 1]} : vector<16x256xf32> to vector<16x128xf32>
    %23 = arith.addf %21, %22 : vector<16x128xf32>
    %24 = vector.broadcast %16 : vector<1x128xf32> to vector<16x128xf32>
    %25 = arith.addf %23, %24 : vector<16x128xf32>
    %26 = arith.negf %25 : vector<16x128xf32>
    %27 = math.exp %26 : vector<16x128xf32>
    %cst_23 = arith.constant 1.000000e+00 : f32
    %28 = vector.broadcast %cst_23 : f32 to vector<16x128xf32>
    %29 = arith.addf %28, %27 : vector<16x128xf32>
    %30 = arith.divf %28, %29 : vector<16x128xf32>
    %31 = vector.extract_strided_slice %11 {offsets = [0, 128], sizes = [16, 128], strides = [1, 1]} : vector<16x384xf32> to vector<16x128xf32>
    %32 = vector.extract_strided_slice %14 {offsets = [0, 128], sizes = [16, 128], strides = [1, 1]} : vector<16x256xf32> to vector<16x128xf32>
    %33 = arith.addf %31, %32 : vector<16x128xf32>
    %34 = vector.broadcast %18 : vector<1x128xf32> to vector<16x128xf32>
    %35 = arith.addf %33, %34 : vector<16x128xf32>
    %36 = arith.negf %35 : vector<16x128xf32>
    %37 = math.exp %36 : vector<16x128xf32>
    %cst_24 = arith.constant 1.000000e+00 : f32
    %38 = vector.broadcast %cst_24 : f32 to vector<16x128xf32>
    %39 = arith.addf %38, %37 : vector<16x128xf32>
    %40 = arith.divf %38, %39 : vector<16x128xf32>
    %41 = arith.mulf %40, %6 : vector<16x128xf32>
    %cst_25 = arith.constant dense<0.000000e+00> : vector<16x128xf32>
    %42 = tpu.matmul %3, %41, %cst_25 {dimension_numbers = #tpu.dot_dimension_numbers<[1], [0], [0], [1], [0, 0, 1, 1], [], []>} : vector<16x16xf32>, vector<16x128xf32>, vector<16x128xf32> -> vector<16x128xf32>
    %43 = vector.extract_strided_slice %11 {offsets = [0, 256], sizes = [16, 128], strides = [1, 1]} : vector<16x384xf32> to vector<16x128xf32>
    %c0_26 = arith.constant 0 : index
    %c0_27 = arith.constant 0 : index
    %c0_28 = arith.constant 0 : index
    %44 = vector.load %arg6[%c0_26, %c0_27, %c0_28] : memref<1x128x128xf32, #tpu.memory_space<vmem>>, vector<1x128x128xf32>
    %45 = vector.shape_cast %44 : vector<1x128x128xf32> to vector<128x128xf32>
    %cst_29 = arith.constant dense<0.000000e+00> : vector<16x128xf32>
    %46 = tpu.matmul %42, %45, %cst_29 {dimension_numbers = #tpu.dot_dimension_numbers<[1], [0], [0], [1], [0, 0, 1, 1], [], []>} : vector<16x128xf32>, vector<128x128xf32>, vector<16x128xf32> -> vector<16x128xf32>
    %47 = arith.addf %43, %46 : vector<16x128xf32>
    %48 = vector.broadcast %20 : vector<1x128xf32> to vector<16x128xf32>
    %49 = arith.addf %47, %48 : vector<16x128xf32>
    %50 = math.tanh %49 : vector<16x128xf32>
    %51 = arith.mulf %30, %6 : vector<16x128xf32>
    %cst_30 = arith.constant 1.000000e+00 : f32
    %52 = vector.broadcast %cst_30 : f32 to vector<16x128xf32>
    %53 = arith.subf %52, %30 : vector<16x128xf32>
    %54 = arith.mulf %53, %50 : vector<16x128xf32>
    %55 = arith.addf %51, %54 : vector<16x128xf32>
    %c0_31 = arith.constant 0 : index
    %c0_32 = arith.constant 0 : index
    %c0_33 = arith.constant 0 : index
    %56 = vector.load %arg8[%c0_31, %c0_32, %c0_33] : memref<1x16x128xf32, #tpu.memory_space<vmem>>, vector<1x16x128xf32>
    %57 = vector.shape_cast %56 : vector<1x16x128xf32> to vector<16x128xf32>
    %58 = vector.shape_cast %55 : vector<16x128xf32> to vector<1x16x128xf32>
    tpu.vector_store %arg8[%c0_31, %c0_32, %c0_33], %58 {strides = array<i32>} : memref<1x16x128xf32, #tpu.memory_space<vmem>>, vector<1x16x128xf32>,
    %c0_34 = arith.constant 0 : index
    %c0_35 = arith.constant 0 : index
    %59 = vector.load %arg9[%c0_34, %c0_35] : memref<16x128xf32, #tpu.memory_space<vmem>>, vector<16x128xf32>
    tpu.vector_store %arg9[%c0_34, %c0_35], %55 {strides = array<i32>} : memref<16x128xf32, #tpu.memory_space<vmem>>, vector<16x128xf32>,
    return
  }
  func.func @transform_0(%arg0: i32) -> (i32, i32) {
    %c0_i32 = arith.constant 0 : i32
    %c0_i32_0 = arith.constant 0 : i32
    %c0_i32_1 = arith.constant 0 : i32
    return %c0_i32, %c0_i32_0 : i32, i32
  }
  func.func @transform_1(%arg0: i32) -> (i32, i32) {
    %c0_i32 = arith.constant 0 : i32
    %c0_i32_0 = arith.constant 0 : i32
    %c0_i32_1 = arith.constant 0 : i32
    return %c0_i32, %c0_i32_0 : i32, i32
  }
  func.func @transform_2(%arg0: i32) -> (i32, i32, i32) {
    %c0_i32 = arith.constant 0 : i32
    %c0_i32_0 = arith.constant 0 : i32
    %c0_i32_1 = arith.constant 0 : i32
    return %arg0, %c0_i32, %c0_i32_0 : i32, i32, i32
  }
  func.func @transform_3(%arg0: i32) -> (i32, i32, i32) {
    %c0_i32 = arith.constant 0 : i32
    %c0_i32_0 = arith.constant 0 : i32
    %c0_i32_1 = arith.constant 0 : i32
    return %arg0, %c0_i32, %c0_i32_0 : i32, i32, i32
  }
  func.func @transform_4(%arg0: i32) -> (i32, i32, i32) {
    %c0_i32 = arith.constant 0 : i32
    %c0_i32_0 = arith.constant 0 : i32
    %c0_i32_1 = arith.constant 0 : i32
    return %arg0, %c0_i32, %c0_i32_0 : i32, i32, i32
  }
  func.func @transform_5(%arg0: i32) -> (i32, i32, i32) {
    %c0_i32 = arith.constant 0 : i32
    %c0_i32_0 = arith.constant 0 : i32
    %c0_i32_1 = arith.constant 0 : i32
    return %arg0, %c0_i32, %c0_i32_0 : i32, i32, i32
  }
  func.func @transform_6(%arg0: i32) -> (i32, i32, i32) {
    %c0_i32 = arith.constant 0 : i32
    %c0_i32_0 = arith.constant 0 : i32
    %c0_i32_1 = arith.constant 0 : i32
    return %arg0, %c0_i32, %c0_i32_0 : i32, i32, i32
  }
  func.func @transform_7(%arg0: i32) -> (i32, i32, i32) {
    %c0_i32 = arith.constant 0 : i32
    %c0_i32_0 = arith.constant 0 : i32
    %c0_i32_1 = arith.constant 0 : i32
    return %arg0, %c0_i32, %c0_i32_0 : i32, i32, i32
  }
}

</mosaic_0001>

<bundles_post_ra>
// kernel: graph_gru_gcn_forward.1
= control target key start
LH: loop header
LB: loop body
LE: loop exit
PB: predicated region body
PF: predicated region fallthrough
CT: control target
= control target key end

     0   :  { %s2195_s0 = inlined_call_operand.vmem [shape: f32[16,16], index: 0, kind: input, shape index: {}]   ;;  %s2196_s1 = inlined_call_operand.vmem [shape: f32[16,128], index: 1, kind: input, shape index: {}]   ;;  %s2197_s2 = inlined_call_operand.vmem [shape: f32[2,16,128], index: 2, kind: input, shape index: {}]   ;;  %s2198_s3 = inlined_call_operand.hbm [shape: f32[2,128,384], index: 3, kind: input, shape index: {}]   ;;  %s2199_s4 = inlined_call_operand.hbm [shape: f32[2,128,256], index: 4, kind: input, shape index: {}]   ;;  %s2200_s5 = inlined_call_operand.hbm [shape: f32[2,128,128], index: 5, kind: input, shape index: {}]   ;;  %s2201_s6 = inlined_call_operand.vmem [shape: f32[2,3,128], index: 6, kind: input, shape index: {}]   ;;  %s2202_s7 = inlined_call_operand.vmem [shape: f32[2,16,128], index: 7, kind: output, shape index: {}]  }
   0x1   :  { %2204 = sst [smem:[#allocation10_spill]] %s2198_s3 }
   0x2   :  { %2205 = sst [smem:[#allocation11_spill]] %s2199_s4 }
   0x3   :  { %12 = vsyncpa [#allocation4], 0 }
   0x4   :  { %14 = vsyncpa [#allocation4 + $0x1], 0 }
   0x5   :  { %15 = vsyncpa [#allocation6], 0 }
   0x6   :  { %17 = vsyncpa [#allocation6 + $0x1], 0  ;;  %s1842_s24 = smov 0   ;;  %s1844_s25 = smov 0  }
   0x7   :  { %s1846_s26 = smov 0   ;;  %s1848_s27 = smov 0  }
   0x8 LB: > { %s1861_s28 = sadd.s32 4294967295, %s1790_s27   ;;  %s1864_s29 = sadd.s32 1, %s1790_s27   ;;  %s1790_s27 = sphi %s1848_s27, %s2217_s27   ;;  %s1786_s26 = sphi %s1846_s26, %s2216_s26   ;;  %s1782_s25 = sphi %s1844_s25, %s2215_s25   ;;  %s1778_s24 = sphi %s1842_s24, %s2214_s24  }
   0x9   : > { %s95_s30 = ssub.s32 %s1790_s27, %s1864_s29  ;;  %s98_s8 = sadd.s32 1, %s1786_s26 }
   0xa   : > { %p96_p0 = scmp.eq.s32.totalorder %s95_s30, 0  ;;  %p105_p1 = scmp.ne.s32.totalorder %s1786_s26, %s1782_s25 }
   0xb   : > { %p106_p2 = scmp.eq.s32.totalorder %s1790_s27, 0  ;;  %p111_p3 = scmp.ne.s32.totalorder %s1782_s25, %s1778_s24 }
   0xc   : > { %s1874_s9 = scalar_select %p96_p0, %s1786_s26, %s98_s8  }
   0xd   : > { %p107_p4 = por %p106_p2, %p105_p1  ;;  %p112_p5 = scmp.eq.s32.totalorder %s1861_s28, 0 }
   0xe   : > { %p1602_p6 = scmp.lt.s32.totalorder %s1790_s27, 2  ;;  %s1883_s11 = sand.u32 1, %s1786_s26  }
   0xf   : > { %p1878_p7 = por %p112_p5, %p111_p3  ;;  %s274_s13 = sand.u32 1, %s1790_s27  }
  0x10   : > { %p1885_p8 = pnand %p1602_p6, %p107_p4  ;;  %s1264_s14 = sshll.u32 %s1883_s11, 8 }
  0x11   : > { %s2206_s10 = scalar_select %p1878_p7, 1, 0 }
  0x12   : > { %s1294_s15 = sshll.u32 %s1790_s27, 12  ;;  %s278_s16 = scalar_lea.vmem [#allocation5], %s1264_s14 }
  0x13   : > { %s285_s17 = sshll.u32 %s278_s16, 4  ;;  %s2208_s4 = sld [smem:[#allocation11_spill]]  ;;  %s1897_s17 = int_to_ptr.vmem [resolvable:$true] %s285_s17 }
  0x14   : > { %s1899_s21 = scalar_lea.sflag [#allocation6], %s274_s13  ;;  %p1905_p10 = pneg %p1885_p8 }
  0x19   : > { %s1895_s20 = scalar_lea.hbm %s2208_s4, %s1294_s15  ;;  %s1667_s8 = scalar_lea.hbm %s2208_s4, 8192 }
  0x1a   : > { %s1662_s22 = scalar_lea.hbm %s1895_s20, 4096  ;;  %p1668_p13 = scmp.lt.u32.totalorder %s1895_s20, %s2208_s4 }
  0x1b   : > { %p1663_p9 = scmp.ne.s32.totalorder %s1895_s20, %s1662_s22  ;;  %p1669_p0 = scmp.lt.u32.totalorder %s1667_s8, %s1662_s22 }
  0x1c   : > { %p1671_p2 = scmp.lt.u32.totalorder %s1662_s22, %s1895_s20 }
  0x1d   : > { %p1665_p11 = pnand %p1905_p10, %p1663_p9  ;;  %p1670_p1 = por %p1669_p0, %p1668_p13 }
  0x1f   : > { %p1666_p12 = pneg %p1665_p11  ;;  %p1672_p3 = por %p1671_p2, %p1670_p1 }
  0x21   : > { %p1673_p4 = pnand %p1672_p3, %p1666_p12 }
  0x23   : > { %1676 = shalt.err (!%p1673_p4)
}
  0x24   : > { %s1677_s13 = scalar_lea.vmem %s1897_s17, 4096  ;;  %s1792_s16 = smov [#allocation5]  }
  0x25   : > { %p1678_p5 = scmp.ne.s32.totalorder %s1897_s17, %s1677_s13  ;;  %s1682_s18 = sshll.u32 %s1792_s16, 4  ;;  %s1683_s18 = int_to_ptr.vmem [resolvable:$false] %s1682_s18 }
  0x26   : > { %s1684_s19 = scalar_lea.vmem %s1683_s18, 8192  ;;  %p1685_p11 = scmp.lt.s32.totalorder %s1897_s17, %s1683_s18 }
  0x27   : > { %p1680_p6 = pnand %p1678_p5, %p1905_p10  ;;  %p1686_p7 = scmp.lt.s32.totalorder %s1684_s19, %s1677_s13 }
  0x29   : > { %p1681_p9 = pneg %p1680_p6  ;;  %p1687_p13 = por %p1686_p7, %p1685_p11 }
  0x2b   : > { %p1688_p0 = pnand %p1687_p13, %p1681_p9 }
  0x2d   : > { %1691 = shalt.err (!%p1688_p0)
}
  0x2e   : > { %s1793_s22 = smov 256   ;;  %s1794_s24 = smov 16  }
  0x2f   : > { %1598 = dma.hbm_to_vmem [thread:$0]  (!%p1885_p8), %s1895_s20, 4096, %s1897_s17, %s1899_s21, %s1793_s22, %s1793_s22, %s1794_s24  }
  0x30   : > { %p1270_p12 = scmp.ge.s32.totalorder %s1790_s27, 1  ;;  %p321_p1 = scmp.lt.s32.totalorder %s1790_s27, 3 }
  0x31   : > { %s1583_s30 = smul.u32 384, %s1883_s11  ;;  %s2211_s3 = sld [smem:[#allocation10_spill]] }
  0x32   : > { %p1932_p7 = pnand %p1270_p12, %p321_p1  ;;  %s1584_s14 = smul.u32 6144, %s1790_s27 }
  0x33   : > { %s257_s18 = scalar_lea.vmem [#allocation3], %s1583_s30  ;;  %s254_s17 = scalar_lea.sflag [#allocation4], %s1883_s11 }
  0x34   : > { %s2210_s8 = scalar_select %p1932_p7, 1, 0 }
  0x35   : > { %s264_s19 = sshll.u32 %s257_s18, 4  ;;  %s1942_s19 = int_to_ptr.vmem [resolvable:$true] %s264_s19 }
  0x37   : > { %s1940_s16 = scalar_lea.hbm %s2211_s3, %s1584_s14  ;;  %s1697_s15 = scalar_lea.hbm %s2211_s3, 12288 }
  0x38   : > { %s1692_s20 = scalar_lea.hbm %s1940_s16, 6144  ;;  %p1698_p5 = scmp.lt.u32.totalorder %s1940_s16, %s2211_s3 }
  0x39   : > { %p1693_p2 = scmp.ne.s32.totalorder %s1940_s16, %s1692_s20  ;;  %p1699_p6 = scmp.lt.u32.totalorder %s1697_s15, %s1692_s20 }
  0x3a   : > { %p1701_p11 = scmp.lt.u32.totalorder %s1692_s20, %s1940_s16 }
  0x3b   : > { %p1695_p3 = pnand %p1693_p2, %p1905_p10  ;;  %p1700_p9 = por %p1699_p6, %p1698_p5 }
  0x3d   : > { %p1696_p4 = pneg %p1695_p3  ;;  %p1702_p13 = por %p1701_p11, %p1700_p9 }
  0x3f   : > { %p1703_p0 = pnand %p1702_p13, %p1696_p4 }
  0x41   : > { %1706 = shalt.err (!%p1703_p0)
}
  0x42   : > { %s1707_s30 = scalar_lea.vmem %s1942_s19, 6144  ;;  %s1795_s18 = smov [#allocation3]  }
  0x43   : > { %p1708_p12 = scmp.ne.s32.totalorder %s1942_s19, %s1707_s30  ;;  %s1712_s22 = sshll.u32 %s1795_s18, 4  ;;  %s1713_s22 = int_to_ptr.vmem [resolvable:$false] %s1712_s22 }
  0x44   : > { %s1714_s24 = scalar_lea.vmem %s1713_s22, 12288  ;;  %p1715_p3 = scmp.lt.s32.totalorder %s1942_s19, %s1713_s22 }
  0x45   : > { %p1710_p1 = pnand %p1708_p12, %p1905_p10  ;;  %p1716_p7 = scmp.lt.s32.totalorder %s1714_s24, %s1707_s30 }
  0x47   : > { %p1711_p2 = pneg %p1710_p1  ;;  %p1717_p5 = por %p1716_p7, %p1715_p3 }
  0x49   : > { %p1718_p6 = pnand %p1717_p5, %p1711_p2 }
  0x4b   : > { %1721 = shalt.err (!%p1718_p6)
}
  0x4c   : > { %s1796_s20 = smov 384   ;;  %s1797_s15 = smov 24  }
  0x4d   : > { %1595 = dma.hbm_to_vmem [thread:$0]  (!%p1885_p8), %s1940_s16, 6144, %s1942_s19, %s254_s17, %s1796_s20, %s1796_s20, %s1797_s15  }
  0x4e   : > { %s1267_s14 = sshll.u32 %s1883_s11, 7  ;;  %s1295_s13 = sshll.u32 %s1790_s27, 11 }
  0x4f   : > { %s1973_s30 = scalar_lea.hbm %s2200_s5, %s1295_s13  ;;  %s299_s24 = scalar_lea.vmem [#allocation7], %s1267_s14 }
  0x50   : > { %s306_s3 = sshll.u32 %s299_s24, 4  ;;  %s1722_s4 = scalar_lea.hbm %s1973_s30, 2048  ;;  %s1975_s3 = int_to_ptr.vmem [resolvable:$true] %s306_s3 }
  0x51   : > { %p1723_p7 = scmp.ne.s32.totalorder %s1973_s30, %s1722_s4  ;;  %s1727_s16 = scalar_lea.hbm %s2200_s5, 4096 }
  0x52   : > { %p1728_p11 = scmp.lt.u32.totalorder %s1973_s30, %s2200_s5  ;;  %p1729_p13 = scmp.lt.u32.totalorder %s1727_s16, %s1722_s4 }
  0x53   : > { %p1725_p4 = pnand %p1723_p7, %p1905_p10  ;;  %p1731_p12 = scmp.lt.u32.totalorder %s1722_s4, %s1973_s30 }
  0x54   : > { %p1730_p0 = por %p1729_p13, %p1728_p11 }
  0x55   : > { %p1726_p9 = pneg %p1725_p4 }
  0x56   : > { %p1732_p1 = por %p1731_p12, %p1730_p0 }
  0x58   : > { %p1733_p2 = pnand %p1732_p1, %p1726_p9 }
  0x5a   : > { %1736 = shalt.err (!%p1733_p2)
}
  0x5b   : > { %s1737_s20 = scalar_lea.vmem %s1975_s3, 2048  ;;  %s1798_s15 = smov [#allocation7]  }
  0x5c   : > { %p1738_p3 = scmp.ne.s32.totalorder %s1975_s3, %s1737_s20  ;;  %s1742_s14 = sshll.u32 %s1798_s15, 4  ;;  %s1743_s14 = int_to_ptr.vmem [resolvable:$false] %s1742_s14 }
  0x5d   : > { %s1744_s13 = scalar_lea.vmem %s1743_s14, 4096  ;;  %p1745_p7 = scmp.lt.s32.totalorder %s1975_s3, %s1743_s14 }
  0x5e   : > { %p1740_p5 = pnand %p1738_p3, %p1905_p10  ;;  %p1746_p4 = scmp.lt.s32.totalorder %s1744_s13, %s1737_s20 }
  0x60   : > { %p1741_p6 = pneg %p1740_p5  ;;  %p1747_p11 = por %p1746_p4, %p1745_p7 }
  0x62   : > { %p1748_p13 = pnand %p1747_p11, %p1741_p6 }
  0x64   : > { %1751 = shalt.err (!%p1748_p13)
}
  0x65   : > { %s1799_s4 = smov 128   ;;  %s1800_s18 = smov 8  }
  0x66   : > { %1601 = dma.hbm_to_vmem [thread:$0]  (!%p1885_p8), %s1973_s30, 2048, %s1975_s3, %s1899_s21, %s1799_s4, %s1799_s4, %s1800_s18  }
  0x67   : > { %p2212_p10 = scmp.ne.s32.totalorder %s2210_s8, 0 }
  0x68   : > { %s327_s23 = sand.u32 (!%p2212_p10), 1, %s1782_s25   ;;  %p2213_p9 = scmp.ne.s32.totalorder (!%p2212_p10), %s2206_s10, 0 }
  0x69   : > { %325 = sbr.rel (%p2212_p10) target bundleno = 1077 (0x435), region = 48  ;;  %s328_s24 = scalar_lea.sflag (!%p2212_p10), [#allocation4], %s327_s23 }
  0x6a   : > { %s1585_s22 = smul.u32 (!%p2212_p10), 384, %s327_s23 }
  0x6c   : > { %s2002_s11 = scalar_lea.vmem (!%p2212_p10), [#allocation3], %s1585_s22 }
  0x70   : > { %1769 = dma.done.wait (%p2213_p9), %s328_s24, 6144  }
  0x71   : > { %1771 = vsyncadd (%p2213_p9), %s328_s24, 4294961152  ;;  %s336_s27 = sand.u32 1, %s1861_s28   ;;  %s1271_s12 = sshll.u32 %s327_s23, 8 }
  0x72   : > { %s337_s3 = scalar_lea.sflag [#allocation6], %s336_s27  ;;  %s2009_s21 = scalar_lea.vmem [#allocation5], %s1271_s12 }
  0x73   : > { %1773 = dma.done.wait (%p2213_p9), %s337_s3, 6144  }
  0x74   : > { %1775 = vsyncadd (%p2213_p9), %s337_s3, 4294961152  ;;  %s1272_s8 = sshll.u32 %s327_s23, 7  ;;  %p399_p8 = scmp.lt.s32.totalorder %s1861_s28, 1 }
  0x75   : > { %s2030_s24 = scalar_lea.vmem [#allocation7], %s1272_s8  ;;  %p1278_p0 = scmp.ne.s32.totalorder %s1861_s28, 0 }
  0x76   : > { %s400_s30 = scalar_select %p399_p8, %s1861_s28, 1 }
  0x77   : > { %416 = sbr.rel (%p1278_p0) target bundleno = 126 (0x7e), region = 64  ;;  %v417_v0 = vld [vmem:[%s2196_s1] sm:$0xff] (!%p1278_p0)  ;;  %v418_v1 = vld [vmem:[%s2196_s1 + $0x8] sm:$0xff] (!%p1278_p0) }
  0x78   : > { %s1296_s16 = sshll.u32 %s400_s30, 4  ;;  %s1275_s19 = sshll.u32 %s400_s30, 2  ;;  %419 = vst [vmem:[#allocation2] sm:$0xff] (!%p1278_p0), %v417_v0  ;;  %420 = vst [vmem:[#allocation2 + $0x8] sm:$0xff] (!%p1278_p0), %v418_v1 }
  0x79   : > { %s403_s15 = scalar_lea.vmem %s2197_s2, %s1296_s16  ;;  %s2023_s4 = scalar_lea.vmem %s2201_s6, %s1275_s19 }
  0x7a   : > { %s2028_s10 = scalar_lea.vmem %s2202_s7, %s1296_s16 }
  0x7e PF: > { %v2042_v4 = vld [vmem:[%s2195_s0] sm:$0xff]  ;;  %vm427_vm0 = vcmask 130048   ;;  %v2048_v7 = vld [vmem:[%s403_s15 + $0x8] sm:$0xff]  ;;  %v585_v10 = vld [vmem:[%s2002_s11 + $0x8] sm:$0xff] }
  0x7f   : > { %v423_v2 = vld [vmem:[#allocation2] sm:$0xff]  ;;  %v424_v3 = vld [vmem:[#allocation2 + $0x8] sm:$0xff]  ;;  %1350 = vmatprep.mubr.msk.f32.mxu0 %vm427_vm0, %v2042_v4  ;;  %1357 = vmatprep.mubr.msk.f32.mxu1 %vm427_vm0, %v2042_v4  ;;  %v588_v11 = vld [vmem:[%s2002_s11 + $0x20] sm:$0xff] }
  0x80   : > { %v1437_v5 = vpack.c.bf16 %v424_v3, %v423_v2  ;;  %v2046_v6 = vld [vmem:[%s403_s15] sm:$0xff]  ;;  %v2055_v8 = vld [vmem:[%s2195_s0 + $0x8] sm:$0xff]  ;;  %v584_v12 = vld [vmem:[%s2002_s11] sm:$0xff]  ;;  %v1445_v13 = vpack.c.bf16 %v588_v11, %v585_v10 }
  0x81   : > { %v1441_v9 = vpack.c.bf16 %v2048_v7, %v2046_v6  ;;  %v587_v14 = vld [vmem:[%s2002_s11 + $0x18] sm:$0xff]  ;;  %v586_v15 = vld [vmem:[%s2002_s11 + $0x10] sm:$0xff]  ;;  %v589_v16 = vld [vmem:[%s2002_s11 + $0x28] sm:$0xff] }
  0x82   : > { %1438 = vmatprep.subr.bf16.mxu0 %v1437_v5  ;;  %v1447_v17 = vpack.c.bf16 %v587_v14, %v584_v12  ;;  %v1477_v18 = vpack.c.bf16 %v589_v16, %v586_v15  ;;  %v591_v19 = vld [vmem:[%s2002_s11 + $0x38] sm:$0xff]  ;;  %v594_v20 = vld [vmem:[%s2002_s11 + $0x50] sm:$0xff]  ;;  %v593_v23 = vld [vmem:[%s2002_s11 + $0x48] sm:$0xff] }
  0x83   : > { %1440 = vmatpush3.bf16.msra.mxu0 %v1437_v5  ;;  %1442 = vmatprep.subr.bf16.mxu1 %v1441_v9  ;;  %v590_v21 = vld [vmem:[%s2002_s11 + $0x30] sm:$0xff]  ;;  %v1449_v22 = vpack.c.bf16 %v594_v20, %v591_v19  ;;  %v592_v24 = vld [vmem:[%s2002_s11 + $0x40] sm:$0xff]  ;;  %v595_v25 = vld [vmem:[%s2002_s11 + $0x58] sm:$0xff] }
  0x84   : > { %1444 = vmatpush3.bf16.msra.mxu1 %v1441_v9  ;;  %1446 = vmatprep.subr.bf16.mxu0 %v1445_v13  ;;  %v1481_v26 = vpack.c.bf16 %v595_v25, %v592_v24  ;;  %v597_v27 = vld [vmem:[%s2002_s11 + $0x68] sm:$0xff]  ;;  %v600_v28 = vld [vmem:[%s2002_s11 + $0x80] sm:$0xff]  ;;  %v598_v29 = vld [vmem:[%s2002_s11 + $0x70] sm:$0xff]  ;;  %v1451_v31 = vpack.c.bf16 %v593_v23, %v590_v21  ;;  %v1801_v25 = vmov 0.0  }
  0x85   : > { %1478 = vmatprep.subr.bf16.mxu1 %v1477_v18  ;;  %v601_v30 = vld [vmem:[%s2002_s11 + $0x88] sm:$0xff]  ;;  %v1453_v32 = vpack.c.bf16 %v600_v28, %v597_v27  ;;  %v596_v33 = vld [vmem:[%s2002_s11 + $0x60] sm:$0xff]  ;;  %v599_v34 = vld [vmem:[%s2002_s11 + $0x78] sm:$0xff] }
  0x86   : > { %1351 = vmatmul.mubr.msk.f32.vlgmr.msra.gmra.mrb[0].mxu0 %vm427_vm0, %v2055_v8  ;;  %v1485_v35 = vpack.c.bf16 %v601_v30, %v598_v29  ;;  %v603_v36 = vld [vmem:[%s2002_s11 + $0x98] sm:$0xff]  ;;  %v606_v37 = vld [vmem:[%s2002_s11 + $0xb0] sm:$0xff]  ;;  %v604_v38 = vld [vmem:[%s2002_s11 + $0xa0] sm:$0xff]  ;;  %v1455_v40 = vpack.c.bf16 %v599_v34, %v596_v33 }
  0x87   : > { %1358 = vmatmul.mubr.msk.f32.vlgmr.msra.gmra.mrb[0].mxu1 %vm427_vm0, %v2055_v8  ;;  %1448 = vmatpush1.bf16.msra.mxu0 %v1447_v17  ;;  %v607_v39 = vld [vmem:[%s2002_s11 + $0xb8] sm:$0xff]  ;;  %v1457_v41 = vpack.c.bf16 %v606_v37, %v603_v36  ;;  %v602_v42 = vld [vmem:[%s2002_s11 + $0x90] sm:$0xff]  ;;  %v605_v43 = vld [vmem:[%s2002_s11 + $0xa8] sm:$0xff] }
  0x88   : > { %1480 = vmatpush3.bf16.msra.mxu1 %v1477_v18  ;;  %1450 = vmatprep.subr.bf16.mxu0 %v1449_v22  ;;  %v1489_v44 = vpack.c.bf16 %v607_v39, %v604_v38  ;;  %v609_v45 = vld [vmem:[%s2002_s11 + $0xc8] sm:$0xff]  ;;  %v612_v46 = vld [vmem:[%s2002_s11 + $0xe0] sm:$0xff]  ;;  %v610_v47 = vld [vmem:[%s2002_s11 + $0xd0] sm:$0xff]  ;;  %v1459_v49 = vpack.c.bf16 %v605_v43, %v602_v42 }
  0x89   : > { %1482 = vmatprep.subr.bf16.mxu1 %v1481_v26  ;;  %v613_v48 = vld [vmem:[%s2002_s11 + $0xe8] sm:$0xff]  ;;  %v1461_v50 = vpack.c.bf16 %v612_v46, %v609_v45  ;;  %v608_v51 = vld [vmem:[%s2002_s11 + $0xc0] sm:$0xff]  ;;  %v611_v52 = vld [vmem:[%s2002_s11 + $0xd8] sm:$0xff]  ;;  %696 = vmatprep.mubr.f32.mxu0 %v1801_v25 }
  0x8a   : > { %v1493_v53 = vpack.c.bf16 %v613_v48, %v610_v47  ;;  %v615_v54 = vld [vmem:[%s2002_s11 + $0xf8] sm:$0xff]  ;;  %v618_v55 = vld [vmem:[%s2002_s11 + $0x110] sm:$0xff]  ;;  %v616_v56 = vld [vmem:[%s2002_s11 + $0x100] sm:$0xff]  ;;  %v1463_v58 = vpack.c.bf16 %v611_v52, %v608_v51 }
  0x8b   : > { %1452 = vmatpush1.bf16.msra.mxu0 %v1451_v31  ;;  %v619_v57 = vld [vmem:[%s2002_s11 + $0x118] sm:$0xff]  ;;  %v1465_v59 = vpack.c.bf16 %v618_v55, %v615_v54  ;;  %v614_v60 = vld [vmem:[%s2002_s11 + $0xf0] sm:$0xff]  ;;  %v617_v61 = vld [vmem:[%s2002_s11 + $0x108] sm:$0xff] }
  0x8c   : > { %1484 = vmatpush3.bf16.msra.mxu1 %v1481_v26  ;;  %1454 = vmatprep.subr.bf16.mxu0 %v1453_v32  ;;  %v1497_v62 = vpack.c.bf16 %v619_v57, %v616_v56  ;;  %v621_v63 = vld [vmem:[%s2002_s11 + $0x128] sm:$0xff]  ;;  %v624_v0 = vld [vmem:[%s2002_s11 + $0x140] sm:$0xff]  ;;  %v622_v1 = vld [vmem:[%s2002_s11 + $0x130] sm:$0xff]  ;;  %v1467_v3 = vpack.c.bf16 %v617_v61, %v614_v60 }
  0x8d   : > { %1486 = vmatprep.subr.bf16.mxu1 %v1485_v35  ;;  %v625_v2 = vld [vmem:[%s2002_s11 + $0x148] sm:$0xff]  ;;  %v1469_v5 = vpack.c.bf16 %v624_v0, %v621_v63  ;;  %v620_v9 = vld [vmem:[%s2002_s11 + $0x120] sm:$0xff]  ;;  %v623_v10 = vld [vmem:[%s2002_s11 + $0x138] sm:$0xff] }
  0x8e   : > { %v1501_v11 = vpack.c.bf16 %v625_v2, %v622_v1  ;;  %v627_v12 = vld [vmem:[%s2002_s11 + $0x158] sm:$0xff]  ;;  %v630_v13 = vld [vmem:[%s2002_s11 + $0x170] sm:$0xff]  ;;  %v628_v14 = vld [vmem:[%s2002_s11 + $0x160] sm:$0xff]  ;;  %v1471_v16 = vpack.c.bf16 %v623_v10, %v620_v9 }
  0x8f   : > { %1456 = vmatpush1.bf16.msra.mxu0 %v1455_v40  ;;  %v631_v15 = vld [vmem:[%s2002_s11 + $0x178] sm:$0xff]  ;;  %v1473_v17 = vpack.c.bf16 %v630_v13, %v627_v12  ;;  %v626_v18 = vld [vmem:[%s2002_s11 + $0x150] sm:$0xff]  ;;  %v629_v19 = vld [vmem:[%s2002_s11 + $0x168] sm:$0xff] }
  0x90   : > { %1488 = vmatpush3.bf16.msra.mxu1 %v1485_v35  ;;  %1458 = vmatprep.subr.bf16.mxu0 %v1457_v41  ;;  %v1505_v20 = vpack.c.bf16 %v631_v15, %v628_v14  ;;  %v1475_v21 = vpack.c.bf16 %v629_v19, %v626_v18  ;;  %v785_v22 = vld [vmem:[%s2009_s21 + $0x8] sm:$0xff]  ;;  %v787_v23 = vld [vmem:[%s2009_s21 + $0x18] sm:$0xff]  ;;  %v784_v26 = vld [vmem:[%s2009_s21] sm:$0xff] }
  0x91   : > { %1490 = vmatprep.subr.bf16.mxu1 %v1489_v44  ;;  %v1509_v24 = vpack.c.bf16 %v787_v23, %v785_v22  ;;  %v786_v27 = vld [vmem:[%s2009_s21 + $0x10] sm:$0xff]  ;;  %v789_v28 = vld [vmem:[%s2009_s21 + $0x28] sm:$0xff]  ;;  %v791_v29 = vld [vmem:[%s2009_s21 + $0x38] sm:$0xff] }
  0x92   : > { %v1511_v30 = vpack.c.bf16 %v786_v27, %v784_v26  ;;  %v1513_v32 = vpack.c.bf16 %v791_v29, %v789_v28  ;;  %v788_v33 = vld [vmem:[%s2009_s21 + $0x20] sm:$0xff]  ;;  %v790_v34 = vld [vmem:[%s2009_s21 + $0x30] sm:$0xff]  ;;  %v793_v36 = vld [vmem:[%s2009_s21 + $0x48] sm:$0xff] }
  0x93   : > { %1460 = vmatpush1.bf16.msra.mxu0 %v1459_v49  ;;  %v795_v37 = vld [vmem:[%s2009_s21 + $0x58] sm:$0xff]  ;;  %v1515_v40 = vpack.c.bf16 %v790_v34, %v788_v33  ;;  %v792_v42 = vld [vmem:[%s2009_s21 + $0x40] sm:$0xff]  ;;  %v794_v43 = vld [vmem:[%s2009_s21 + $0x50] sm:$0xff] }
  0x94   : > { %1492 = vmatpush3.bf16.msra.mxu1 %v1489_v44  ;;  %1462 = vmatprep.subr.bf16.mxu0 %v1461_v50  ;;  %v1517_v41 = vpack.c.bf16 %v795_v37, %v793_v36  ;;  %v797_v44 = vld [vmem:[%s2009_s21 + $0x68] sm:$0xff]  ;;  %v799_v45 = vld [vmem:[%s2009_s21 + $0x78] sm:$0xff]  ;;  %v1519_v46 = vpack.c.bf16 %v794_v43, %v792_v42  ;;  %v796_v48 = vld [vmem:[%s2009_s21 + $0x60] sm:$0xff] }
  0x95   : > { %1494 = vmatprep.subr.bf16.mxu1 %v1493_v53  ;;  %v1521_v47 = vpack.c.bf16 %v799_v45, %v797_v44  ;;  %v798_v49 = vld [vmem:[%s2009_s21 + $0x70] sm:$0xff]  ;;  %v801_v50 = vld [vmem:[%s2009_s21 + $0x88] sm:$0xff]  ;;  %v803_v51 = vld [vmem:[%s2009_s21 + $0x98] sm:$0xff] }
  0x96   : > { %v1525_v52 = vpack.c.bf16 %v803_v51, %v801_v50  ;;  %v802_v54 = vld [vmem:[%s2009_s21 + $0x90] sm:$0xff]  ;;  %v805_v55 = vld [vmem:[%s2009_s21 + $0xa8] sm:$0xff]  ;;  %v807_v56 = vld [vmem:[%s2009_s21 + $0xb8] sm:$0xff] }
  0x97   : > { %1464 = vmatpush1.bf16.msra.mxu0 %v1463_v58  ;;  %v1529_v58 = vpack.c.bf16 %v807_v56, %v805_v55  ;;  %v806_v60 = vld [vmem:[%s2009_s21 + $0xb0] sm:$0xff]  ;;  %v809_v61 = vld [vmem:[%s2009_s21 + $0xc8] sm:$0xff]  ;;  %v808_v1 = vld [vmem:[%s2009_s21 + $0xc0] sm:$0xff] }
  0x98   : > { %1496 = vmatpush3.bf16.msra.mxu1 %v1493_v53  ;;  %1466 = vmatprep.subr.bf16.mxu0 %v1465_v59  ;;  %v800_v53 = vld [vmem:[%s2009_s21 + $0x80] sm:$0xff]  ;;  %v810_v2 = vld [vmem:[%s2009_s21 + $0xd0] sm:$0xff]  ;;  %v1016_v36 = vld [vmem:[%s2030_s24 + $0x18] sm:$0xff] }
  0x99   : > { %1498 = vmatprep.subr.bf16.mxu1 %v1497_v62  ;;  %v1527_v57 = vpack.c.bf16 %v802_v54, %v800_v53  ;;  %v804_v59 = vld [vmem:[%s2009_s21 + $0xa0] sm:$0xff]  ;;  %v1535_v9 = vpack.c.bf16 %v810_v2, %v808_v1  ;;  %v814_v12 = vld [vmem:[%s2009_s21 + $0xf0] sm:$0xff]  ;;  %v1020_v42 = vld [vmem:[%s2030_s24 + $0x38] sm:$0xff] }
  0x9a   : > { %v1531_v63 = vpack.c.bf16 %v806_v60, %v804_v59  ;;  %v1286_v14 = vld [vmem:[%s2023_s4 + $0x1] ss:$0 sm:$0xff]  ;;  %v1013_v29 = vld [vmem:[%s2030_s24] sm:$0xff]  ;;  %v1022_v45 = vld [vmem:[%s2030_s24 + $0x48] sm:$0xff] }
  0x9b   : > { %1468 = vmatpush1.bf16.msra.mxu0 %v1467_v3  ;;  %v813_v3 = vld [vmem:[%s2009_s21 + $0xe8] sm:$0xff]  ;;  %v1021_v44 = vld [vmem:[%s2030_s24 + $0x40] sm:$0xff]  ;;  %v1283_v56 = vld [vmem:[%s2023_s4] ss:$0 sm:$0xff] }
  0x9c   : > { %1500 = vmatpush3.bf16.msra.mxu1 %v1497_v62  ;;  %1470 = vmatprep.subr.bf16.mxu0 %v1469_v5  ;;  %v811_v62 = vld [vmem:[%s2009_s21 + $0xd8] sm:$0xff]  ;;  %v1026_v50 = vld [vmem:[%s2030_s24 + $0x68] sm:$0xff]  ;;  %v1291_v1 = vld [vmem:[%s2023_s4 + $0x2] ss:$0 sm:$0xff] }
  0x9d   : > { %1502 = vmatprep.subr.bf16.mxu1 %v1501_v11  ;;  %v1533_v0 = vpack.c.bf16 %v811_v62, %v809_v61  ;;  %v815_v5 = vld [vmem:[%s2009_s21 + $0xf8] sm:$0xff] }
  0x9e   : > { %v1537_v10 = vpack.c.bf16 %v815_v5, %v813_v3 }
  0x9f   : > { %1472 = vmatpush1.bf16.msra.mxu0 %v1471_v16 }
  0xa0   : > { %1504 = vmatpush3.bf16.msra.mxu1 %v1501_v11  ;;  %1474 = vmatprep.subr.bf16.mxu0 %v1473_v17  ;;  %v812_v11 = vld [vmem:[%s2009_s21 + $0xe0] sm:$0xff] }
  0xa1   : > { %1506 = vmatprep.subr.bf16.mxu1 %v1505_v20  ;;  %v1539_v13 = vpack.c.bf16 %v814_v12, %v812_v11 }
  0xa3   : > { %1476 = vmatpush1.bf16.msra.mxu0 %v1475_v21 }
  0xa4   : > { %1508 = vmatpush3.bf16.msra.mxu1 %v1505_v20  ;;  %1510 = vmatprep.subr.bf16.mxu0 %v1509_v24 }
 0x159   : > { %v1352_v31 = vpop.f32.mrb[0].mxu0 }
 0x15a   : > { %v500_v35 = vpop.f32.mrb[1].mxu0  ;;  %v1359_v38 = vpop.f32.mrb[0].mxu1 }
 0x15b   : > { %697 = vmatmul.mubr.f32.vlgmr.msra.gmra.mrb[2].mxu0 %v500_v35  ;;  %1392 = vmatprep.mubr.f32.mxu1 %v500_v35  ;;  %v575_v39 = vpop.f32.mrb[1].mxu1  ;;  %v1015_v35 = vld [vmem:[%s2030_s24 + $0x10] sm:$0xff] }
 0x15c   : > { %1512 = vmatpush1.bf16.msra.mxu0 %v1511_v30  ;;  %1393 = vmatmul.mubr.f32.vlgmr.msra.gmra.mrb[2].mxu1 %v1352_v31  ;;  %v1014_v30 = vld [vmem:[%s2030_s24 + $0x8] sm:$0xff]  ;;  %v1549_v37 = vpack.c.bf16 %v1016_v36, %v1015_v35 }
 0x15d   : > { %702 = vmatprep.mubr.f32.mxu0 %v1801_v25  ;;  %1514 = vmatprep.subr.bf16.mxu0 %v1513_v32  ;;  %v1545_v34 = vpack.c.bf16 %v1014_v30, %v1013_v29 }
 0x15e   : > { %1399 = vmatprep.mubr.msk.f32.mxu1 %vm427_vm0, %v2042_v4  ;;  %v1523_v4 = vpack.c.bf16 %v798_v49, %v796_v48  ;;  %v1024_v48 = vld [vmem:[%s2030_s24 + $0x58] sm:$0xff]  ;;  %v1025_v49 = vld [vmem:[%s2030_s24 + $0x60] sm:$0xff] }
 0x15f   : > { %703 = vmatmul.mubr.f32.gmra.mrb[4].mxu0 %v1352_v31  ;;  %v1569_v51 = vpack.c.bf16 %v1026_v50, %v1025_v49 }
 0x160   : > { %1516 = vmatpush1.bf16.msra.mxu0 %v1515_v40  ;;  %880 = vmatprep.mubr.f32.mxu0 %v1801_v25 }
 0x161   : > { %1518 = vmatprep.subr.bf16.mxu0 %v1517_v41  ;;  %v1019_v41 = vld [vmem:[%s2030_s24 + $0x30] sm:$0xff] }
 0x162   : > { %v1557_v43 = vpack.c.bf16 %v1020_v42, %v1019_v41 }
 0x164   : > { %1520 = vmatpush1.bf16.msra.mxu0 %v1519_v46  ;;  %v1561_v46 = vpack.c.bf16 %v1022_v45, %v1021_v44 }
 0x165   : > { %1522 = vmatprep.subr.bf16.mxu0 %v1521_v47  ;;  %v1023_v47 = vld [vmem:[%s2030_s24 + $0x50] sm:$0xff] }
 0x168   : > { %1524 = vmatpush1.bf16.msra.mxu0 %v1523_v4  ;;  %v1027_v4 = vld [vmem:[%s2030_s24 + $0x70] sm:$0xff] }
 0x169   : > { %1526 = vmatprep.subr.bf16.mxu0 %v1525_v52  ;;  %v1028_v52 = vld [vmem:[%s2030_s24 + $0x78] sm:$0xff] }
 0x16a   : > { %v1573_v53 = vpack.c.bf16 %v1028_v52, %v1027_v4 }
 0x16c   : > { %1528 = vmatpush1.bf16.msra.mxu0 %v1527_v57 }
 0x16d   : > { %1530 = vmatprep.subr.bf16.mxu0 %v1529_v58 }
 0x170   : > { %1532 = vmatpush1.bf16.msra.mxu0 %v1531_v63 }
 0x171   : > { %1534 = vmatprep.subr.bf16.mxu0 %v1533_v0 }
 0x174   : > { %1536 = vmatpush1.bf16.msra.mxu0 %v1535_v9 }
 0x175   : > { %1538 = vmatprep.subr.bf16.mxu0 %v1537_v10 }
 0x178   : > { %1540 = vmatpush1.bf16.msra.mxu0 %v1539_v13 }
 0x17b   : > { %881 = vmatmul.mubr.f32.vlgmr.msra.gmra.mrb[2].mxu0 %v575_v39  ;;  %v1018_v39 = vld [vmem:[%s2030_s24 + $0x28] sm:$0xff] }
 0x17c   : > { %886 = vmatprep.mubr.f32.mxu0 %v1801_v25 }
 0x17f   : > { %887 = vmatmul.mubr.f32.gmra.mrb[4].mxu0 %v1359_v38  ;;  %v1017_v38 = vld [vmem:[%s2030_s24 + $0x20] sm:$0xff] }
 0x180   : > { %v1553_v40 = vpack.c.bf16 %v1018_v39, %v1017_v38 }
 0x24e   : > { %v2150_v15 = vpop.f32.mrb[2].mxu0 }
 0x24f   : > { %v884_v16 = vpop.f32.mrb[3].mxu0  ;;  %v902_v58 = vadd.f32 %v1283_v56, %v2150_v15 }
 0x250   : > { %v922_v17 = vadd.f32 %v1286_v14, %v884_v16 }
 0x251   : > { %v1284_v60 = vmul.f32 -1.442695, %v902_v58 }
 0x252   : > { %v1287_v18 = vmul.f32 -1.442695, %v922_v17  ;;  %v2152_v19 = vpop.f32.mrb[4].mxu0 }
 0x253   : > { %v890_v20 = vpop.f32.mrb[5].mxu0  ;;  %v903_v57 = vadd.f32 %v1283_v56, %v2152_v19 }
 0x254   : > { %1642 = vpow2.f32 %v1287_v18  ;;  %v923_v21 = vadd.f32 %v1286_v14, %v890_v20 }
 0x255   : > { %v1285_v59 = vmul.f32 -1.442695, %v903_v57 }
 0x256   : > { %v1288_v22 = vmul.f32 -1.442695, %v923_v21 }
 0x258   : > { %1644 = vpow2.f32 %v1288_v22 }
 0x25e   : > { %v1643_v23 = vpop.eup %1642 }
 0x25f   : > { %v930_v24 = vadd.f32 1.0, %v1643_v23 }
 0x261   : > { %1646 = vrcp.f32 %v930_v24 }
 0x262   : > { %v1645_v25 = vpop.eup %1644 }
 0x263   : > { %v931_v26 = vadd.f32 1.0, %v1645_v25 }
 0x265   : > { %1648 = vrcp.f32 %v931_v26 }
 0x266   : > { %1650 = vpow2.f32 %v1285_v59 }
 0x267   : > { %1652 = vpow2.f32 %v1284_v60 }
 0x26b   : > { %v1647_v27 = vpop.eup %1646 }
 0x26c   : > { %v936_v31 = vmul.f32 %v1647_v27, %v2046_v6 }
 0x26f   : > { %v1649_v28 = vpop.eup %1648 }
 0x270   : > { %v937_v32 = vmul.f32 %v1649_v28, %v2048_v7  ;;  %v1651_v61 = vpop.eup %1650 }
 0x271   : > { %v1653_v62 = vpop.eup %1652  ;;  %v911_v63 = vadd.f32 1.0, %v1651_v61 }
 0x272   : > { %v1541_v33 = vpack.c.bf16 %v937_v32, %v936_v31  ;;  %v910_v0 = vadd.f32 1.0, %v1653_v62 }
 0x273   : > { %1654 = vrcp.f32 %v911_v63 }
 0x274   : > { %1542 = vmatprep.subr.bf16.mxu1 %v1541_v33  ;;  %1656 = vrcp.f32 %v910_v0 }
 0x275   : > { %1544 = vmatpush3.bf16.msra.mxu1 %v1541_v33 }
 0x276   : > { %1546 = vmatprep.subr.bf16.mxu1 %v1545_v34 }
 0x278   : > { %1400 = vmatmul.mubr.msk.f32.vlgmr.msra.gmra.mrb[4].mxu1 %vm427_vm0, %v2055_v8  ;;  %v1565_v8 = vpack.c.bf16 %v1024_v48, %v1023_v47 }
 0x279   : > { %1548 = vmatpush3.bf16.msra.mxu1 %v1545_v34 }
 0x27a   : > { %1550 = vmatprep.subr.bf16.mxu1 %v1549_v37 }
 0x27d   : > { %1552 = vmatpush3.bf16.msra.mxu1 %v1549_v37  ;;  %v1655_v10 = vpop.eup %1654 }
 0x27e   : > { %1554 = vmatprep.subr.bf16.mxu1 %v1553_v40  ;;  %v1657_v11 = vpop.eup %1656  ;;  %v1117_v12 = vsub.f32 1.0, %v1655_v10  ;;  %v1115_v16 = vmul.f32 %v1655_v10, %v2048_v7 }
 0x27f   : > { %v1116_v14 = vsub.f32 1.0, %v1657_v11  ;;  %v1114_v18 = vmul.f32 %v1657_v11, %v2046_v6 }
 0x281   : > { %1556 = vmatpush3.bf16.msra.mxu1 %v1553_v40 }
 0x282   : > { %1558 = vmatprep.subr.bf16.mxu1 %v1557_v43 }
 0x285   : > { %1560 = vmatpush3.bf16.msra.mxu1 %v1557_v43 }
 0x286   : > { %1562 = vmatprep.subr.bf16.mxu1 %v1561_v46 }
 0x289   : > { %1564 = vmatpush3.bf16.msra.mxu1 %v1561_v46 }
 0x28a   : > { %1566 = vmatprep.subr.bf16.mxu1 %v1565_v8 }
 0x28d   : > { %1568 = vmatpush3.bf16.msra.mxu1 %v1565_v8 }
 0x28e   : > { %1570 = vmatprep.subr.bf16.mxu1 %v1569_v51 }
 0x291   : > { %1572 = vmatpush3.bf16.msra.mxu1 %v1569_v51 }
 0x292   : > { %1574 = vmatprep.subr.bf16.mxu1 %v1573_v53 }
 0x295   : > { %1576 = vmatpush3.bf16.msra.mxu1 %v1573_v53 }
 0x34b   : > { %v1401_v54 = vpop.f32.mrb[4].mxu1 }
 0x34c   : > { %v1004_v55 = vpop.f32.mrb[5].mxu1 }
 0x34d   : > { %1434 = vmatprep.mubr.f32.mxu1 %v1004_v55 }
 0x34e   : > { %1435 = vmatmul.mubr.f32.vlgmr.msra.gmra.mrb[2].mxu1 %v1401_v54 }
 0x421   : > { %v1436_v2 = vpop.f32.mrb[2].mxu1 }
 0x422   : > { %v1111_v3 = vadd.f32 %v1436_v2, %v1291_v1  ;;  %v1095_v5 = vpop.f32.mrb[3].mxu1 }
 0x423   : > { %v1110_v9 = vadd.f32 %v1291_v1, %v1095_v5 }
 0x424   : > { %1658 = vtanh.f32 %v1111_v3 }
 0x425   : > { %1660 = vtanh.f32 %v1110_v9 }
 0x42e   : > { %v1659_v13 = vpop.eup %1658 }
 0x42f   : > { %v1661_v15 = vpop.eup %1660  ;;  %v1119_v17 = vmul.f32 %v1659_v13, %v1117_v12 }
 0x430   : > { %v1118_v19 = vmul.f32 %v1661_v15, %v1116_v14 }
 0x431   : > { %v1121_v20 = vadd.f32 %v1119_v17, %v1115_v16 }
 0x432   : > { %v1120_v21 = vadd.f32 %v1118_v19, %v1114_v18 }
 0x433   : > { %1123 = vst [vmem:[%s2028_s10 + $0x8] sm:$0xff] %v1121_v20  ;;  %1125 = vst [vmem:[#allocation2 + $0x8] sm:$0xff] %v1121_v20 }
 0x434   : > { %1122 = vst [vmem:[%s2028_s10] sm:$0xff] %v1120_v21  ;;  %1124 = vst [vmem:[#allocation2] sm:$0xff] %v1120_v21 }
 0x435 PF: > { %p20_p12 = scmp.ge.s32.totalorder %s1864_s29, 4   ;;  %s2214_s24 = smov %s1782_s25 }
 0x436   : > { %s2215_s25 = smov %s1786_s26  ;;  %s2216_s26 = smov %s1874_s9 }
 0x437   : > { %s2217_s27 = smov %s1864_s29  ;;  %22 = sbr.rel (!%p20_p12) target bundleno = 8 (0x8), region = 122 }
 0x43e   :  { %1147 = vsyncpa [#allocation4], 1 }
 0x43f   :  { %1149 = vsyncpa [#allocation4 + $0x1], 1 }
 0x440   :  { %1150 = vsyncpa [#allocation6], 1 }
 0x441   :  { %1152 = vsyncpa [#allocation6 + $0x1], 1 }

</bundles_post_ra>
